<compile_context>
chip_gen: v6e
topology: v6e:2x2x1
jax: 0.10.0
libtpu: 0.0.40
codegen_flags: <defaults>
</compile_context>

<pallas_src>
import functools

import jax
import jax.numpy as jnp
from jax.experimental import pallas as pl
from jax.experimental.pallas import tpu as pltpu


def mlp_kernel(xt_ref, p_ref, ot_ref, *, hiddens):
    """xt_ref: (1, Np) input with batch on lanes (lane-padded).
    p_ref : (ceil8(3H+1), 1) packed params:
            rows [0,H)=w1 col, [H,2H)=b1, [2H,3H)=w2^T col, row 3H=b2.
    ot_ref: (1, Np) output, batch on lanes."""
    w1 = p_ref[0:hiddens, :]                             # (H, 1)
    b1 = p_ref[hiddens:2 * hiddens, :]                   # (H, 1)
    w2t = p_ref[2 * hiddens:3 * hiddens, :]              # (H, 1)
    b2 = p_ref[3 * hiddens:3 * hiddens + 1, :]           # (1, 1)

    # Layer 1 (K = F = 1): VPU outer product, fused bias + ReLU.
    #   (H, 1) * (1, Np) + (H, 1) -> (H, Np)
    h = jnp.maximum(w1 * xt_ref[...] + b1, 0.0)
    # Layer 2: contraction over H on the sublane axis (XLU reduction):
    #   sum_H ((H, 1) * (H, Np)) -> (1, Np), plus bias (1, 1).
    y = jnp.sum(w2t * h, axis=0, keepdims=True) + b2
    ot_ref[...] = y.astype(ot_ref.dtype)


@jax.jit
def net_forward(x, w1, b1, w2, b2):
    """Forward pass with PyTorch-layout parameters (jitted: single dispatch).

    x : (N, F)                 input  (F must be 1)
    w1: (H, F), b1: (H,)       hidden Linear
    w2: (O, H), b2: (O,)       predict Linear (O must be 1)
    Returns y: (N, O) — same semantics as the torch module.
    """
    N, F = x.shape
    H = w1.shape[0]
    O = w2.shape[0]
    assert F == 1 and O == 1, "kernel specialized to n_features=1, o_features=1"

    # Lane-dense, lane-padded input: batch on the lane (last) axis, padded to
    # a multiple of 128 so all vector ops / stores are full-lane & unmasked.
    Np = ((N + 127) // 128) * 128
    x_t = jnp.pad(x.T, ((0, 0), (0, Np - N)))            # (1, Np)

    # Pack every parameter into one sublane-stacked VMEM buffer (2 DMAs total).
    rows = 3 * H + 1
    rows_p = ((rows + 7) // 8) * 8                        # sublane-aligned (104)
    params = jnp.concatenate(
        [w1.reshape(H, 1),        # rows [0, H)
         b1.reshape(H, 1),        # rows [H, 2H)
         w2.T.reshape(H, 1),      # rows [2H, 3H)
         b2.reshape(1, 1)],       # row  3H
        axis=0)
    params = jnp.pad(params, ((0, rows_p - rows), (0, 0)))  # (rows_p, 1)

    vmem = pl.BlockSpec(memory_space=pltpu.MemorySpace.VMEM)
    y_t = pl.pallas_call(
        functools.partial(mlp_kernel, hiddens=H),
        out_shape=jax.ShapeDtypeStruct((O, Np), x.dtype),
        in_specs=[vmem, vmem],
        out_specs=vmem,
    )(x_t, params)

    # Drop the padded lanes (they hold garbage derived from relu(b1)),
    # return in the original (N, O) layout.
    return y_t[:, :N].T


def init_linear_params(key, fan_in, fan_out):
    """Mimic torch.nn.Linear default init: U(-k, k), k = 1/sqrt(fan_in).

    Returned in PyTorch layout: W (fan_out, fan_in), b (fan_out,).
    """
    k = 1.0 / jnp.sqrt(jnp.float32(fan_in))
    kw, kb = jax.random.split(key)
    w = jax.random.uniform(kw, (fan_out, fan_in), jnp.float32, -k, k)
    b = jax.random.uniform(kb, (fan_out,), jnp.float32, -k, k)
    return w, b


if __name__ == "__main__":
    # Shapes implied by the module usage:
    # x = linspace(-1, 1, 100).unsqueeze(1) -> (100, 1); Net(1, 32, 1).
    n_features, hiddens, o_features = 1, 32, 1

    key = jax.random.PRNGKey(0)
    k1, k2 = jax.random.split(key)
    w1, b1 = init_linear_params(k1, n_features, hiddens)   # (32, 1), (32,)
    w2, b2 = init_linear_params(k2, hiddens, o_features)   # (1, 32), (1,)

    x = jnp.expand_dims(jnp.linspace(-1.0, 1.0, 100, dtype=jnp.float32), axis=1)

    y = net_forward(x, w1, b1, w2, b2)
    y = jax.block_until_ready(y)

    # Pure-JAX reference (PyTorch semantics: y = relu(x @ W1.T + b1) @ W2.T + b2)
    ref = jnp.maximum(x @ w1.T + b1, 0.0) @ w2.T + b2
    assert y.shape == (100, o_features)
    assert jnp.allclose(y, ref, atol=1e-5, rtol=1e-5)

    print("KERNEL_OK")
</pallas_src>

<mosaic_0001>
module attributes {stable_mosaic.version = 11 : i64} {
  func.func @mlp_kernel(%arg0: memref<1x128xf32, #tpu.memory_space<vmem>>, %arg1: memref<104x1xf32, #tpu.memory_space<vmem>>, %arg2: memref<1x128xf32, #tpu.memory_space<vmem>>) attributes {dimension_semantics = [], scalar_prefetch = 0 : i64, scratch_operands = 0 : i64, tpu.core_type = #tpu.core_type<tc>} {
    %c0 = arith.constant 0 : index
    %c0_0 = arith.constant 0 : index
    %0 = vector.load %arg1[%c0, %c0_0] : memref<104x1xf32, #tpu.memory_space<vmem>>, vector<32x1xf32>
    %c32 = arith.constant 32 : index
    %c0_1 = arith.constant 0 : index
    %1 = vector.load %arg1[%c32, %c0_1] : memref<104x1xf32, #tpu.memory_space<vmem>>, vector<32x1xf32>
    %c64 = arith.constant 64 : index
    %c0_2 = arith.constant 0 : index
    %2 = vector.load %arg1[%c64, %c0_2] : memref<104x1xf32, #tpu.memory_space<vmem>>, vector<32x1xf32>
    %c96 = arith.constant 96 : index
    %c0_3 = arith.constant 0 : index
    %3 = vector.load %arg1[%c96, %c0_3] : memref<104x1xf32, #tpu.memory_space<vmem>>, vector<1x1xf32>
    %c0_4 = arith.constant 0 : index
    %c0_5 = arith.constant 0 : index
    %4 = vector.load %arg0[%c0_4, %c0_5] : memref<1x128xf32, #tpu.memory_space<vmem>>, vector<1x128xf32>
    %5 = vector.broadcast %0 : vector<32x1xf32> to vector<32x128xf32>
    %6 = vector.broadcast %4 : vector<1x128xf32> to vector<32x128xf32>
    %7 = arith.mulf %5, %6 : vector<32x128xf32>
    %8 = vector.broadcast %1 : vector<32x1xf32> to vector<32x128xf32>
    %9 = arith.addf %7, %8 : vector<32x128xf32>
    %cst = arith.constant 0.000000e+00 : f32
    %10 = vector.broadcast %cst : f32 to vector<32x128xf32>
    %11 = arith.maximumf %9, %10 : vector<32x128xf32>
    %12 = vector.broadcast %2 : vector<32x1xf32> to vector<32x128xf32>
    %13 = arith.mulf %12, %11 : vector<32x128xf32>
    %cst_6 = arith.constant dense<0.000000e+00> : vector<128xf32>
    %14 = vector.multi_reduction <add>, %13, %cst_6 [0] : vector<32x128xf32> to vector<128xf32>
    %15 = vector.shape_cast %14 : vector<128xf32> to vector<1x128xf32>
    %16 = vector.broadcast %3 : vector<1x1xf32> to vector<1x128xf32>
    %17 = arith.addf %15, %16 : vector<1x128xf32>
    %c0_7 = arith.constant 0 : index
    %c0_8 = arith.constant 0 : index
    %18 = vector.load %arg2[%c0_7, %c0_8] : memref<1x128xf32, #tpu.memory_space<vmem>>, vector<1x128xf32>
    tpu.vector_store %arg2[%c0_7, %c0_8], %17 {strides = array<i32>} : memref<1x128xf32, #tpu.memory_space<vmem>>, vector<1x128xf32>,
    return
  }
}

</mosaic_0001>

<bundles_post_ra>
// kernel: net_forward.1
= control target key start
LH: loop header
LB: loop body
LE: loop exit
PB: predicated region body
PF: predicated region fallthrough
CT: control target
= control target key end

     0   :  { %v131_v0 = vmov 0   ;;  %s192_s1 = inlined_call_operand.vmem [shape: f32[104,1], index: 1, kind: input, shape index: {}]   ;;  %s193_s0 = inlined_call_operand.vmem [shape: f32[1,128], index: 0, kind: input, shape index: {}]   ;;  %s194_s2 = inlined_call_operand.vmem [shape: f32[1,128], index: 2, kind: output, shape index: {}]  }
   0x1   :  { %130 = vset.pattern.permute.xlu1 %v131_v0  ;;  %129 = vset.pattern.permute.xlu0 %v131_v0  ;;  %v13_v1 = vld [vmem:[%s192_s1 + $0x10] sm:$0xff]  ;;  %v11_v2 = vld [vmem:[%s192_s1] sm:$0xff]  ;;  %v12_v4 = vld [vmem:[%s192_s1 + $0x8] sm:$0xff] }
   0x2   :  { %37 = vperm.xlu1 %130, %v13_v1   ;;  %27 = vperm.xlu0 %129, %v11_v2   ;;  %v15_v3 = vld [vmem:[%s192_s1 + $0x20] sm:$0xff]  ;;  %v14_v5 = vld [vmem:[%s192_s1 + $0x18] sm:$0xff]  ;;  %v16_v6 = vld [vmem:[%s192_s1 + $0x28] sm:$0xff] }
   0x3   :  { %v18_v7 = vld [vmem:[%s192_s1 + $0x38] sm:$0xff]  ;;  %v17_v8 = vld [vmem:[%s192_s1 + $0x30] sm:$0xff]  ;;  %v20_v9 = vld [vmem:[%s192_s1 + $0x48] sm:$0xff] }
   0x4   :  { %v19_v10 = vld [vmem:[%s192_s1 + $0x40] sm:$0xff]  ;;  %v22_v11 = vld [vmem:[%s192_s1 + $0x58] sm:$0xff]  ;;  %v21_v12 = vld [vmem:[%s192_s1 + $0x50] sm:$0xff] }
   0x5   :  { %v23_v13 = vld [vmem:[%s192_s1 + $0x60] sm:$0x1] }
   0x6   :  { %57 = vperm.xlu1 %130, %v15_v3   ;;  %32 = vperm.xlu0 %129, %v12_v4   ;;  %v127_v18 = vld [vmem:[%s193_s0] ss:$0 sm:$0xff] }
   0xa   :  { %42 = vperm.xlu1 %130, %v14_v5   ;;  %62 = vperm.xlu0 %129, %v16_v6  }
   0xe   :  { %72 = vperm.xlu1 %130, %v18_v7   ;;  %67 = vperm.xlu0 %129, %v17_v8  }
  0x12   :  { %90 = vperm.xlu1 %130, %v20_v9   ;;  %85 = vperm.xlu0 %129, %v19_v10  }
  0x16   :  { %100 = vperm.xlu1 %130, %v22_v11   ;;  %95 = vperm.xlu0 %129, %v21_v12  }
  0x1a   :  { %118 = vperm.xlu0 %129, %v23_v13  }
  0x7d   :  { %v38_v14 = vpop.permute.xlu1 %37  ;;  %v28_v15 = vpop.permute.xlu0 %27 }
  0x7e   :  { %v51_v21 = vmul.f32 %v127_v18, %v28_v15  ;;  %v53_v27 = vmul.f32 %v127_v18, %v38_v14 }
  0x81   :  { %v58_v16 = vpop.permute.xlu1 %57  ;;  %v33_v17 = vpop.permute.xlu0 %32 }
  0x82   :  { %v52_v22 = vmul.f32 %v127_v18, %v33_v17  ;;  %v75_v23 = vadd.f32 %v58_v16, %v51_v21 }
  0x84   :  { %v79_v28 = vmax.f32 %v75_v23, 0.0 }
  0x85   :  { %v43_v19 = vpop.permute.xlu1 %42  ;;  %v63_v20 = vpop.permute.xlu0 %62 }
  0x86   :  { %v76_v24 = vadd.f32 %v63_v20, %v52_v22  ;;  %v54_v29 = vmul.f32 %v127_v18, %v43_v19 }
  0x88   :  { %v80_v30 = vmax.f32 %v76_v24, 0.0 }
  0x89   :  { %v73_v25 = vpop.permute.xlu1 %72  ;;  %v68_v26 = vpop.permute.xlu0 %67 }
  0x8a   :  { %v77_v31 = vadd.f32 %v68_v26, %v53_v27  ;;  %v78_v34 = vadd.f32 %v73_v25, %v54_v29 }
  0x8c   :  { %v81_v37 = vmax.f32 %v77_v31, 0.0  ;;  %v82_v40 = vmax.f32 %v78_v34, 0.0 }
  0x8d   :  { %v91_v32 = vpop.permute.xlu1 %90  ;;  %v86_v33 = vpop.permute.xlu0 %85 }
  0x8e   :  { %v104_v35 = vmul.f32 %v91_v32, %v80_v30  ;;  %v103_v36 = vmul.f32 %v86_v33, %v79_v28 }
  0x90   :  { %v107_v41 = vadd.f32 %v104_v35, %v103_v36 }
  0x91   :  { %v101_v38 = vpop.permute.xlu1 %100  ;;  %v96_v39 = vpop.permute.xlu0 %95 }
  0x92   :  { %v105_v42 = vmul.f32 %v96_v39, %v81_v37  ;;  %v106_v43 = vmul.f32 %v101_v38, %v82_v40 }
  0x94   :  { %v108_v44 = vadd.f32 %v107_v41, %v105_v42 }
  0x95   :  { %v119_v52 = vpop.permute.xlu0 %118 }
  0x96   :  { %v109_v45 = vadd.f32 %v108_v44, %v106_v43 }
  0x98   :  { %v110_v46 = vrot.slane %v109_v45, 4 }
  0x9a   :  { %v111_v47 = vadd.f32 %v110_v46, %v109_v45 }
  0x9c   :  { %v112_v48 = vrot.slane %v111_v47, 2 }
  0x9e   :  { %v113_v49 = vadd.f32 %v112_v48, %v111_v47 }
  0xa0   :  { %v114_v50 = vrot.slane %v113_v49, 1 }
  0xa2   :  { %v115_v51 = vadd.f32 %v114_v50, %v113_v49 }
  0xa4   :  { %v121_v53 = vadd.f32 %v119_v52, %v115_v51 }
  0xa6   :  { %122 = vst [vmem:[%s194_s2] sm:$0x1] %v121_v53 }

</bundles_post_ra>
